<compile_context>
chip_gen: v5e
topology: v5e:2x2
jax: 0.10.0
libtpu: 0.0.40
codegen_flags: <defaults>
</compile_context>

<pallas_src>
import functools

import jax
import jax.numpy as jnp
from jax.experimental import pallas as pl
from jax.experimental.pallas import tpu as pltpu


# --------------------------------------------------------------------------
# Hardware introspection helpers (trace-time only, with safe fallbacks).
# --------------------------------------------------------------------------
def _device_kind() -> str:
    try:
        return jax.devices()[0].device_kind.lower()
    except Exception:
        return ""


def _vmem_capacity_bytes() -> int:
    try:
        return int(pltpu.get_tpu_info().vmem_capacity_bytes)
    except Exception:
        # Conservative default (v5e/v6e have 128 MiB; v7x has 64 MiB).
        kind = _device_kind()
        return (64 if "v7" in kind else 128) * 1024 * 1024


def _gelu_compute_dtype():
    # v6e/v7x have bf16 VPU/EUP -> halve the (tm, tf) intermediate footprint.
    # v5e (and older) lack bf16 vector units -> keep the GELU in f32.
    kind = _device_kind()
    return jnp.bfloat16 if ("v6" in kind or "v7" in kind) else jnp.float32


def _default_tiles():
    cap = _vmem_capacity_bytes()
    kind = _device_kind()
    if "v7" in kind or cap <= 64 * 1024 * 1024:
        # v7x: 64 MiB VMEM per TC; both TCs stream the same weights, so keep
        # tm high (compute-bound) and tf small (VMEM-bound).
        return 1024, 512
    if "v6" in kind:
        return 1024, 1024
    # v5e / older: compute-bound already at tm=512; tf=1024 halves weight VMEM.
    return 512, 1024


def _pick_tile(pref: int, total: int, align: int = 256) -> int:
    """Largest tile <= pref that divides total, preferring multiples of align."""
    t = min(pref, total)
    if t >= align:
        t = (t // align) * align
        while t >= align and total % t != 0:
            t -= align
    if t < align or total % t != 0:
        t = min(pref, total)
        while total % t != 0:
            t -= 1
    return max(t, 1)


def _maybe_single_buffered():
    """pipeline_mode for blocks whose index is constant along the inner axis."""
    try:
        return pl.Buffered(1)
    except Exception:  # pragma: no cover - older jax without pl.Buffered
        return None


# --------------------------------------------------------------------------
# Kernel
# --------------------------------------------------------------------------
def ffn_kernel(x_ref, w1_ref, w2_ref, o_ref, acc_ref, *, gelu_dtype):
    f = pl.program_id(1)

    @pl.when(f == 0)
    def _():
        acc_ref[...] = jnp.zeros_like(acc_ref)

    # First matmul on the MXU: bf16 operands, f32 accumulation.
    h = jnp.dot(x_ref[...], w1_ref[...], preferred_element_type=jnp.float32)
    # tanh-approximate GELU (matches torch F.gelu(..., approximate='tanh')).
    g = jax.nn.gelu(h.astype(gelu_dtype), approximate=True)
    # Second matmul: partial product of the F reduction for this F tile.
    acc_ref[...] += jnp.dot(
        g.astype(w2_ref.dtype), w2_ref[...],
        preferred_element_type=jnp.float32,
    )

    @pl.when(f == pl.num_programs(1) - 1)
    def _():
        o_ref[...] = acc_ref[...].astype(o_ref.dtype)


def ffn_pallas(x, w1, w2, *, tm=None, tf=None,
               compute_dtype=jnp.bfloat16, gelu_dtype=None):
    """x: [T, H]  w1: [H, F]  w2: [F, H]  ->  [T, H] (x.dtype)."""
    T, H = x.shape
    F = w1.shape[1]
    assert w1.shape == (H, F) and w2.shape == (F, H)

    dtm, dtf = _default_tiles()
    tm = dtm if tm is None else tm
    tf = dtf if tf is None else tf
    if gelu_dtype is None:
        gelu_dtype = _gelu_compute_dtype()

    # Clamp tiles to the problem size, preferring 256-aligned divisors
    # (2x256x256 MXU on v6e/v7x).  Falls back to exact divisors for small T/F.
    # TODO(synk): ragged T/F with no good divisor should be padded caller-side.
    tm = _pick_tile(tm, T)
    tf = _pick_tile(tf, F)
    assert T % tm == 0 and F % tf == 0

    out_dtype = x.dtype
    xc = x.astype(compute_dtype)
    w1c = w1.astype(compute_dtype)
    w2c = w2.astype(compute_dtype)

    itemsize = jnp.dtype(compute_dtype).itemsize
    out_itemsize = jnp.dtype(out_dtype).itemsize
    gelu_itemsize = jnp.dtype(gelu_dtype).itemsize

    # VMEM footprint: single-buffered x/out tiles, double-buffered w1/w2
    # tiles, the f32 accumulator scratch, and the (tm, tf) intra-kernel
    # intermediates (h in f32, gelu output, bf16 cast before the second dot).
    tile_bytes = (
        tm * H * itemsize                             # x tile (Buffered(1))
        + tm * H * out_itemsize                       # out tile (Buffered(1))
        + 2 * (H * tf + tf * H) * itemsize            # w1 / w2 (double-buffered)
        + tm * H * 4                                  # f32 accumulator scratch
        + tm * tf * (4 + gelu_itemsize + itemsize)    # h + gelu + cast
    )
    vmem_cap = _vmem_capacity_bytes()
    vmem_limit = int(min(max(tile_bytes * 1.2, 32 * 1024 * 1024),
                         vmem_cap * 0.85))

    # Accurate HBM traffic: x once, weights re-streamed per token tile, out once.
    n_token_tiles = T // tm
    cost = pl.CostEstimate(
        flops=4 * T * H * F,            # two matmuls: 2*T*H*F each
        transcendentals=T * F,          # tanh in the GELU
        bytes_accessed=int(
            T * H * itemsize
            + n_token_tiles * (H * F + F * H) * itemsize
            + T * H * out_itemsize
        ),
    )

    single_buf = _maybe_single_buffered()
    if single_buf is not None:
        x_spec = pl.BlockSpec((tm, H), lambda i, f: (i, 0),
                              pipeline_mode=single_buf)
        o_spec = pl.BlockSpec((tm, H), lambda i, f: (i, 0),
                              pipeline_mode=single_buf)
    else:
        x_spec = pl.BlockSpec((tm, H), lambda i, f: (i, 0))
        o_spec = pl.BlockSpec((tm, H), lambda i, f: (i, 0))

    grid = (T // tm, F // tf)
    return pl.pallas_call(
        functools.partial(ffn_kernel, gelu_dtype=gelu_dtype),
        out_shape=jax.ShapeDtypeStruct((T, H), out_dtype),
        grid_spec=pltpu.PrefetchScalarGridSpec(
            num_scalar_prefetch=0,
            grid=grid,
            in_specs=[
                x_spec,                                        # x (resident over f)
                pl.BlockSpec((H, tf), lambda i, f: (0, f)),    # w1 column tile
                pl.BlockSpec((tf, H), lambda i, f: (f, 0)),    # w2 row tile
            ],
            out_specs=o_spec,
            scratch_shapes=[pltpu.VMEM((tm, H), jnp.float32)],
        ),
        compiler_params=pltpu.CompilerParams(
            dimension_semantics=("parallel", "arbitrary"),
            vmem_limit_bytes=vmem_limit,
        ),
        cost_estimate=cost,
    )(xc, w1c, w2c)


if __name__ == "__main__":
    # Small shapes consistent with the module: seq=64, batch=2, hidden=128,
    # ffn_hidden=256 (tokens = 128, aligned to the (8,128) vreg tile).
    seq, batch, hidden, ffn_hidden = 64, 2, 128, 256

    key = jax.random.PRNGKey(0)
    kx, k1, k2 = jax.random.split(key, 3)

    x = jax.random.normal(kx, (seq, batch, hidden), dtype=jnp.float32)
    # Deterministic "init" of the parameters (torch.empty is uninitialized;
    # we use scaled normals so values are well-behaved).
    w1 = jax.random.normal(k1, (hidden, ffn_hidden), dtype=jnp.float32) * 0.02
    w2 = jax.random.normal(k2, (ffn_hidden, hidden), dtype=jnp.float32) * 0.02

    # Flatten leading dims to tokens for the kernel, restore afterwards.
    x2d = x.reshape(-1, hidden)
    out2d = ffn_pallas(x2d, w1, w2)
    out = out2d.reshape(seq, batch, hidden)
    jax.block_until_ready(out)

    # Reference 1: same bf16-operand / f32-accumulation path in plain JAX,
    # using the same gelu compute dtype the kernel used on this chip.
    gelu_dtype = _gelu_compute_dtype()
    xb = x2d.astype(jnp.bfloat16)
    w1b = w1.astype(jnp.bfloat16)
    w2b = w2.astype(jnp.bfloat16)
    h_ref = jnp.dot(xb, w1b, preferred_element_type=jnp.float32)
    g_ref = jax.nn.gelu(h_ref.astype(gelu_dtype),
                        approximate=True).astype(jnp.bfloat16)
    ref_bf16 = jnp.dot(g_ref, w2b, preferred_element_type=jnp.float32)
    ref_bf16 = ref_bf16.reshape(seq, batch, hidden)
    assert jnp.allclose(out, ref_bf16, atol=2e-3, rtol=2e-3), \
        "mismatch vs bf16-path reference"

    # Reference 2: full-f32 module semantics (loose tolerance for bf16 operands).
    ref_f32 = jnp.dot(jax.nn.gelu(jnp.dot(x2d, w1), approximate=True), w2)
    ref_f32 = ref_f32.reshape(seq, batch, hidden)
    assert jnp.allclose(out, ref_f32, atol=1e-2, rtol=1e-2), \
        "mismatch vs f32 module reference"

    print("KERNEL_OK")
</pallas_src>

<mosaic_0001>
module attributes {stable_mosaic.version = 11 : i64} {
  func.func @ffn_kernel(%arg0: i32, %arg1: i32, %arg2: memref<128x128xbf16, #tpu.memory_space<vmem>>, %arg3: memref<128x256xbf16, #tpu.memory_space<vmem>>, %arg4: memref<256x128xbf16, #tpu.memory_space<vmem>>, %arg5: memref<128x128xf32, #tpu.memory_space<vmem>>, %arg6: memref<128x128xf32, #tpu.memory_space<vmem>>) attributes {dimension_semantics = [#tpu.dimension_semantics<parallel>, #tpu.dimension_semantics<arbitrary>], iteration_bounds = array<i64: 1, 1>, scalar_prefetch = 0 : i64, scratch_operands = 1 : i64, tpu.core_type = #tpu.core_type<tc>, window_params = [{pipeline_mode = #tpu.pipeline_mode<synchronous>, transform_indices = @transform_0, window_bounds = array<i64: 128, 128>}, {transform_indices = @transform_1, window_bounds = array<i64: 128, 256>}, {transform_indices = @transform_2, window_bounds = array<i64: 256, 128>}, {pipeline_mode = #tpu.pipeline_mode<synchronous>, transform_indices = @transform_3, window_bounds = array<i64: 128, 128>}]} {
    %c0_i32 = arith.constant 0 : i32
    %0 = arith.cmpi eq, %arg1, %c0_i32 : i32
    %1 = arith.extui %0 : i1 to i32
    %c0_i32_0 = arith.constant 0 : i32
    %2 = arith.cmpi ne, %1, %c0_i32_0 : i32
    scf.if %2 {
      %cst_17 = arith.constant 0.000000e+00 : f32
      %28 = vector.broadcast %cst_17 : f32 to vector<128x128xf32>
      %c0_18 = arith.constant 0 : index
      %c0_19 = arith.constant 0 : index
      %29 = vector.load %arg6[%c0_18, %c0_19] : memref<128x128xf32, #tpu.memory_space<vmem>>, vector<128x128xf32>
      tpu.vector_store %arg6[%c0_18, %c0_19], %28 {strides = array<i32>} : memref<128x128xf32, #tpu.memory_space<vmem>>, vector<128x128xf32>,
    } else {
    }
    %c0 = arith.constant 0 : index
    %c0_1 = arith.constant 0 : index
    %3 = vector.load %arg2[%c0, %c0_1] : memref<128x128xbf16, #tpu.memory_space<vmem>>, vector<128x128xbf16>
    %c0_2 = arith.constant 0 : index
    %c0_3 = arith.constant 0 : index
    %4 = vector.load %arg3[%c0_2, %c0_3] : memref<128x256xbf16, #tpu.memory_space<vmem>>, vector<128x256xbf16>
    %cst = arith.constant dense<0.000000e+00> : vector<128x256xf32>
    %5 = tpu.matmul %3, %4, %cst {dimension_numbers = #tpu.dot_dimension_numbers<[1], [0], [0], [1], [0, 0, 1, 1], [], []>} : vector<128x128xbf16>, vector<128x256xbf16>, vector<128x256xf32> -> vector<128x256xf32>
    %6 = arith.mulf %5, %5 : vector<128x256xf32>
    %7 = arith.mulf %5, %6 : vector<128x256xf32>
    %cst_4 = arith.constant 4.471500e-02 : f32
    %8 = vector.broadcast %cst_4 : f32 to vector<128x256xf32>
    %9 = arith.mulf %8, %7 : vector<128x256xf32>
    %10 = arith.addf %5, %9 : vector<128x256xf32>
    %cst_5 = arith.constant 0.797884583 : f32
    %11 = vector.broadcast %cst_5 : f32 to vector<128x256xf32>
    %12 = arith.mulf %11, %10 : vector<128x256xf32>
    %13 = math.tanh %12 : vector<128x256xf32>
    %cst_6 = arith.constant 1.000000e+00 : f32
    %14 = vector.broadcast %cst_6 : f32 to vector<128x256xf32>
    %15 = arith.addf %14, %13 : vector<128x256xf32>
    %cst_7 = arith.constant 5.000000e-01 : f32
    %16 = vector.broadcast %cst_7 : f32 to vector<128x256xf32>
    %17 = arith.mulf %16, %15 : vector<128x256xf32>
    %18 = arith.mulf %5, %17 : vector<128x256xf32>
    %c0_8 = arith.constant 0 : index
    %c0_9 = arith.constant 0 : index
    %19 = vector.load %arg6[%c0_8, %c0_9] : memref<128x128xf32, #tpu.memory_space<vmem>>, vector<128x128xf32>
    %20 = arith.truncf %18 : vector<128x256xf32> to vector<128x256xbf16>
    %c0_10 = arith.constant 0 : index
    %c0_11 = arith.constant 0 : index
    %21 = vector.load %arg4[%c0_10, %c0_11] : memref<256x128xbf16, #tpu.memory_space<vmem>>, vector<256x128xbf16>
    %cst_12 = arith.constant dense<0.000000e+00> : vector<128x128xf32>
    %22 = tpu.matmul %20, %21, %cst_12 {dimension_numbers = #tpu.dot_dimension_numbers<[1], [0], [0], [1], [0, 0, 1, 1], [], []>} : vector<128x256xbf16>, vector<256x128xbf16>, vector<128x128xf32> -> vector<128x128xf32>
    %23 = arith.addf %19, %22 : vector<128x128xf32>
    %c0_13 = arith.constant 0 : index
    %c0_14 = arith.constant 0 : index
    %24 = vector.load %arg6[%c0_13, %c0_14] : memref<128x128xf32, #tpu.memory_space<vmem>>, vector<128x128xf32>
    tpu.vector_store %arg6[%c0_13, %c0_14], %23 {strides = array<i32>} : memref<128x128xf32, #tpu.memory_space<vmem>>, vector<128x128xf32>,
    %c0_i32_15 = arith.constant 0 : i32
    %25 = arith.cmpi eq, %arg1, %c0_i32_15 : i32
    %26 = arith.extui %25 : i1 to i32
    %c0_i32_16 = arith.constant 0 : i32
    %27 = arith.cmpi ne, %26, %c0_i32_16 : i32
    scf.if %27 {
      %c0_17 = arith.constant 0 : index
      %c0_18 = arith.constant 0 : index
      %28 = vector.load %arg6[%c0_17, %c0_18] : memref<128x128xf32, #tpu.memory_space<vmem>>, vector<128x128xf32>
      %c0_19 = arith.constant 0 : index
      %c0_20 = arith.constant 0 : index
      %29 = vector.load %arg5[%c0_19, %c0_20] : memref<128x128xf32, #tpu.memory_space<vmem>>, vector<128x128xf32>
      tpu.vector_store %arg5[%c0_19, %c0_20], %28 {strides = array<i32>} : memref<128x128xf32, #tpu.memory_space<vmem>>, vector<128x128xf32>,
    } else {
    }
    return
  }
  func.func @transform_0(%arg0: i32, %arg1: i32) -> (i32, i32) {
    %c0_i32 = arith.constant 0 : i32
    %c0_i32_0 = arith.constant 0 : i32
    return %arg0, %c0_i32 : i32, i32
  }
  func.func @transform_1(%arg0: i32, %arg1: i32) -> (i32, i32) {
    %c0_i32 = arith.constant 0 : i32
    %c0_i32_0 = arith.constant 0 : i32
    return %c0_i32, %arg1 : i32, i32
  }
  func.func @transform_2(%arg0: i32, %arg1: i32) -> (i32, i32) {
    %c0_i32 = arith.constant 0 : i32
    %c0_i32_0 = arith.constant 0 : i32
    return %arg1, %c0_i32 : i32, i32
  }
  func.func @transform_3(%arg0: i32, %arg1: i32) -> (i32, i32) {
    %c0_i32 = arith.constant 0 : i32
    %c0_i32_0 = arith.constant 0 : i32
    return %arg0, %c0_i32 : i32, i32
  }
}

</mosaic_0001>

<bundles_post_ra>
// kernel: tpu_custom_call.1
= control target key start
LH: loop header
LB: loop body
LE: loop exit
PB: predicated region body
PF: predicated region fallthrough
CT: control target
= control target key end

     0   :  { %8 = vsyncpa [#allocation4], 0  ;;  %s1589_s0 = inlined_call_operand.hbm [shape: bf16[128,128], index: 0, kind: input, shape index: {}]   ;;  %s1590_s1 = inlined_call_operand.hbm [shape: bf16[128,256], index: 1, kind: input, shape index: {}]   ;;  %s1591_s2 = inlined_call_operand.hbm [shape: bf16[256,128], index: 2, kind: input, shape index: {}]   ;;  %s1592_s3 = inlined_call_operand.hbm [shape: f32[128,128], index: 3, kind: output, shape index: {}]  }
   0x1   :  { %9 = vsyncpa [#allocation7], 0  ;;  %s28_s14 = sshll.u32 %s1590_s1, 4  ;;  %s29_s14 = int_to_ptr.hbm [resolvable:$true] %s28_s14 }
   0x2   :  { %10 = vsyncpa [#allocation5], 0  ;;  %s1347_s15 = smov [#allocation6]   ;;  %s15_s19 = sshll.u32 %s1589_s0, 4  ;;  %s16_s19 = int_to_ptr.hbm [resolvable:$true] %s15_s19 }
   0x3   :  { %s30_s16 = sshll.u32 %s1347_s15, 4  ;;  %s1348_s20 = smov 128   ;;  %s31_s16 = int_to_ptr.vmem [resolvable:$true] %s30_s16 }
   0x4   :  { %s1349_s21 = smov 8   ;;  %s1350_s22 = smov [#allocation3]  }
   0x5   :  { %36 = dma.hbm_to_vmem [thread:$0]  %s29_s14, 2048, %s31_s16, [#allocation7], %s1348_s20, %s1348_s20, %s1349_s21  }
   0x6   :  { %s17_s23 = sshll.u32 %s1350_s22, 4  ;;  %s1351_s1 = smov 64   ;;  %s18_s23 = int_to_ptr.vmem [resolvable:$true] %s17_s23 }
   0x7   :  { %s1352_s24 = smov 4   ;;  %s41_s27 = sshll.u32 %s1591_s2, 4  ;;  %s42_s27 = int_to_ptr.hbm [resolvable:$true] %s41_s27 }
   0x8   :  { %23 = dma.hbm_to_vmem [thread:$0]  %s16_s19, 1024, %s18_s23, [#allocation4], %s1351_s1, %s1351_s1, %s1352_s24  }
   0x9   :  { %s1353_s28 = smov [#allocation8]  }
   0xa   :  { %s43_s0 = sshll.u32 %s1353_s28, 4  ;;  %s44_s0 = int_to_ptr.vmem [resolvable:$true] %s43_s0 }
   0xb   :  { %49 = dma.hbm_to_vmem [thread:$0]  %s42_s27, 2048, %s44_s0, [#allocation7], %s1351_s1, %s1351_s1, %s1352_s24  }
   0xc   :  { %1341 = dma.done.wait [#allocation4], 1024  }
   0xd   :  { %1342 = vsyncadd [#allocation4], 4294966272 }
   0xe   :  { %1343 = dma.done.wait [#allocation7], 4096  }
   0xf   :  { %1344 = vsyncadd [#allocation7], 4294963200  ;;  %v1063_v0 = vld [vmem:[#allocation6 + $0x70] sm:$0xf]  ;;  %v1156_v1 = vld [vmem:[#allocation6 + $0x74] sm:$0xf0] }
  0x10   :  { %v1155_v2 = vld [vmem:[#allocation6 + $0x74] sm:$0xf]  ;;  %v1064_v3 = vor.u32 %v1156_v1, %v1063_v0  ;;  %v1065_v4 = vld [vmem:[#allocation6 + $0x78] sm:$0xf0]  ;;  %v1055_v5 = vld [vmem:[#allocation6 + $0x60] sm:$0xf] }
  0x11   :  { %v1154_v6 = vld [vmem:[#allocation6 + $0x64] sm:$0xf0]  ;;  %v1068_v7 = vor.u32 %v1155_v2, %v1065_v4  ;;  %v1153_v8 = vld [vmem:[#allocation6 + $0x64] sm:$0xf]  ;;  %v1057_v9 = vld [vmem:[#allocation6 + $0x68] sm:$0xf0] }
  0x12   :  { %242 = vmatpush.bf16.msra.mxu0 %v1064_v3  ;;  %v1056_v10 = vor.u32 %v1154_v6, %v1055_v5  ;;  %v1060_v11 = vor.u32 %v1153_v8, %v1057_v9  ;;  %v1047_v12 = vld [vmem:[#allocation6 + $0x50] sm:$0xf]  ;;  %v1152_v13 = vld [vmem:[#allocation6 + $0x54] sm:$0xf0]  ;;  %v1151_v14 = vld [vmem:[#allocation6 + $0x54] sm:$0xf] }
  0x13   :  { %291 = vmatpush.bf16.msra.mxu1 %v1068_v7  ;;  %v1049_v15 = vld [vmem:[#allocation6 + $0x58] sm:$0xf0]  ;;  %v1048_v16 = vor.u32 %v1152_v13, %v1047_v12  ;;  %v1039_v18 = vld [vmem:[#allocation6 + $0x40] sm:$0xf]  ;;  %v1150_v19 = vld [vmem:[#allocation6 + $0x44] sm:$0xf0] }
  0x14   :  { %v1052_v17 = vor.u32 %v1151_v14, %v1049_v15  ;;  %v1149_v20 = vld [vmem:[#allocation6 + $0x44] sm:$0xf]  ;;  %v1041_v21 = vld [vmem:[#allocation6 + $0x48] sm:$0xf0]  ;;  %v1040_v22 = vor.u32 %v1150_v19, %v1039_v18  ;;  %v1031_v24 = vld [vmem:[#allocation6 + $0x30] sm:$0xf] }
  0x15   :  { %v1044_v23 = vor.u32 %v1149_v20, %v1041_v21  ;;  %v1148_v25 = vld [vmem:[#allocation6 + $0x34] sm:$0xf0]  ;;  %v1147_v26 = vld [vmem:[#allocation6 + $0x34] sm:$0xf]  ;;  %v1033_v27 = vld [vmem:[#allocation6 + $0x38] sm:$0xf0] }
  0x16   :  { %243 = vmatpush.bf16.msra.mxu0 %v1056_v10  ;;  %v1032_v28 = vor.u32 %v1148_v25, %v1031_v24  ;;  %v1036_v29 = vor.u32 %v1147_v26, %v1033_v27  ;;  %v1023_v30 = vld [vmem:[#allocation6 + $0x20] sm:$0xf]  ;;  %v1146_v31 = vld [vmem:[#allocation6 + $0x24] sm:$0xf0]  ;;  %v1145_v32 = vld [vmem:[#allocation6 + $0x24] sm:$0xf] }
  0x17   :  { %292 = vmatpush.bf16.msra.mxu1 %v1060_v11  ;;  %v1025_v33 = vld [vmem:[#allocation6 + $0x28] sm:$0xf0]  ;;  %v1024_v34 = vor.u32 %v1146_v31, %v1023_v30  ;;  %v1015_v36 = vld [vmem:[#allocation6 + $0x10] sm:$0xf]  ;;  %v1144_v37 = vld [vmem:[#allocation6 + $0x14] sm:$0xf0] }
  0x18   :  { %v1028_v35 = vor.u32 %v1145_v32, %v1025_v33  ;;  %v1143_v38 = vld [vmem:[#allocation6 + $0x14] sm:$0xf]  ;;  %v1017_v39 = vld [vmem:[#allocation6 + $0x18] sm:$0xf0]  ;;  %v1016_v40 = vor.u32 %v1144_v37, %v1015_v36  ;;  %v1007_v42 = vld [vmem:[#allocation6] sm:$0xf] }
  0x19   :  { %v1020_v41 = vor.u32 %v1143_v38, %v1017_v39  ;;  %v1142_v43 = vld [vmem:[#allocation6 + $0x4] sm:$0xf0]  ;;  %v1141_v44 = vld [vmem:[#allocation6 + $0x4] sm:$0xf]  ;;  %v1009_v45 = vld [vmem:[#allocation6 + $0x8] sm:$0xf0] }
  0x1a   :  { %244 = vmatpush.bf16.msra.mxu0 %v1048_v16  ;;  %v1008_v46 = vor.u32 %v1142_v43, %v1007_v42  ;;  %v1012_v47 = vor.u32 %v1141_v44, %v1009_v45  ;;  %v1133_v48 = vld [vmem:[#allocation3] sm:$0xff]  ;;  %v1134_v49 = vld [vmem:[#allocation3 + $0x8] sm:$0xff]  ;;  %v1135_v50 = vld [vmem:[#allocation3 + $0x10] sm:$0xff]  ;;  %s1354_s2 = smov [#allocation9]   ;;  %s959_s5 = sshll.u32 %s1592_s3, 4  ;;  %s960_s5 = int_to_ptr.hbm [resolvable:$true] %s959_s5 }
  0x1b   :  { %293 = vmatpush.bf16.msra.mxu1 %v1052_v17  ;;  %v1136_v51 = vld [vmem:[#allocation3 + $0x18] sm:$0xff]  ;;  %v1137_v52 = vld [vmem:[#allocation3 + $0x20] sm:$0xff]  ;;  %v1138_v53 = vld [vmem:[#allocation3 + $0x28] sm:$0xff]  ;;  %s957_s29 = sshll.u32 %s1354_s2, 4  ;;  %s958_s29 = int_to_ptr.vmem [resolvable:$true] %s957_s29 }
  0x1c   :  { %v1139_v54 = vld [vmem:[#allocation3 + $0x30] sm:$0xff]  ;;  %v1164_v55 = vld [vmem:[#allocation8 + $0x38] sm:$0xff]  ;;  %v1162_v59 = vld [vmem:[#allocation8 + $0x28] sm:$0xff] }
  0x1d   :  { %v1172_v56 = vld [vmem:[#allocation8 + $0x78] sm:$0xff]  ;;  %788 = vmatpush.bf16.msra.mxu2 %v1164_v55  ;;  %v1163_v57 = vld [vmem:[#allocation8 + $0x30] sm:$0xff]  ;;  %v1170_v60 = vld [vmem:[#allocation8 + $0x68] sm:$0xff] }
  0x1e   :  { %245 = vmatpush.bf16.msra.mxu0 %v1040_v22  ;;  %837 = vmatpush.bf16.msra.mxu3 %v1172_v56  ;;  %v1171_v58 = vld [vmem:[#allocation8 + $0x70] sm:$0xff]  ;;  %v1161_v61 = vld [vmem:[#allocation8 + $0x20] sm:$0xff]  ;;  %v1140_v63 = vld [vmem:[#allocation3 + $0x38] sm:$0xff] }
  0x1f   :  { %294 = vmatpush.bf16.msra.mxu1 %v1044_v23  ;;  %v1169_v62 = vld [vmem:[#allocation8 + $0x60] sm:$0xff]  ;;  %v1160_v0 = vld [vmem:[#allocation8 + $0x18] sm:$0xff]  ;;  %v1159_v2 = vld [vmem:[#allocation8 + $0x10] sm:$0xff] }
  0x20   :  { %v1168_v1 = vld [vmem:[#allocation8 + $0x58] sm:$0xff]  ;;  %v1167_v3 = vld [vmem:[#allocation8 + $0x50] sm:$0xff]  ;;  %v1158_v4 = vld [vmem:[#allocation8 + $0x8] sm:$0xff] }
  0x21   :  { %789 = vmatpush.bf16.msra.mxu2 %v1163_v57  ;;  %v1166_v5 = vld [vmem:[#allocation8 + $0x48] sm:$0xff]  ;;  %v1157_v6 = vld [vmem:[#allocation8] sm:$0xff] }
  0x22   :  { %246 = vmatpush.bf16.msra.mxu0 %v1032_v28  ;;  %838 = vmatpush.bf16.msra.mxu3 %v1171_v58  ;;  %v1165_v7 = vld [vmem:[#allocation8 + $0x40] sm:$0xff] }
  0x23   :  { %295 = vmatpush.bf16.msra.mxu1 %v1036_v29 }
  0x25   :  { %790 = vmatpush.bf16.msra.mxu2 %v1162_v59 }
  0x26   :  { %247 = vmatpush.bf16.msra.mxu0 %v1024_v34  ;;  %839 = vmatpush.bf16.msra.mxu3 %v1170_v60 }
  0x27   :  { %296 = vmatpush.bf16.msra.mxu1 %v1028_v35 }
  0x29   :  { %791 = vmatpush.bf16.msra.mxu2 %v1161_v61 }
  0x2a   :  { %248 = vmatpush.bf16.msra.mxu0 %v1016_v40  ;;  %840 = vmatpush.bf16.msra.mxu3 %v1169_v62 }
  0x2b   :  { %297 = vmatpush.bf16.msra.mxu1 %v1020_v41 }
  0x2d   :  { %792 = vmatpush.bf16.msra.mxu2 %v1160_v0 }
  0x2e   :  { %249 = vmatpush.bf16.msra.mxu0 %v1008_v46  ;;  %841 = vmatpush.bf16.msra.mxu3 %v1168_v1 }
  0x2f   :  { %298 = vmatpush.bf16.msra.mxu1 %v1012_v47 }
  0x31   :  { %250 = vmatmul.bf16.vlgmr.msra.gmra.mxu0 %v1133_v48  ;;  %793 = vmatpush.bf16.msra.mxu2 %v1159_v2 }
  0x32   :  { %299 = vmatmul.bf16.vlgmr.msra.gmra.mxu1 %v1133_v48  ;;  %842 = vmatpush.bf16.msra.mxu3 %v1167_v3 }
  0x35   :  { %794 = vmatpush.bf16.msra.mxu2 %v1158_v4 }
  0x36   :  { %843 = vmatpush.bf16.msra.mxu3 %v1166_v5 }
  0x39   :  { %795 = vmatpush.bf16.msra.mxu2 %v1157_v6 }
  0x3a   :  { %844 = vmatpush.bf16.msra.mxu3 %v1165_v7 }
  0x41   :  { %255 = vmatmul.bf16.gmra.mxu0 %v1134_v49 }
  0x42   :  { %304 = vmatmul.bf16.gmra.mxu1 %v1134_v49 }
  0x51   :  { %260 = vmatmul.bf16.gmra.mxu0 %v1135_v50 }
  0x52   :  { %309 = vmatmul.bf16.gmra.mxu1 %v1135_v50 }
  0x61   :  { %265 = vmatmul.bf16.gmra.mxu0 %v1136_v51 }
  0x62   :  { %314 = vmatmul.bf16.gmra.mxu1 %v1136_v51 }
  0x71   :  { %270 = vmatmul.bf16.gmra.mxu0 %v1137_v52 }
  0x72   :  { %319 = vmatmul.bf16.gmra.mxu1 %v1137_v52 }
  0x81   :  { %275 = vmatmul.bf16.gmra.mxu0 %v1138_v53 }
  0x82   :  { %324 = vmatmul.bf16.gmra.mxu1 %v1138_v53 }
  0x91   :  { %280 = vmatmul.bf16.gmra.mxu0 %v1139_v54 }
  0x92   :  { %329 = vmatmul.bf16.gmra.mxu1 %v1139_v54 }
  0xa1   :  { %285 = vmatmul.bf16.gmra.mxu0 %v1140_v63 }
  0xa2   :  { %334 = vmatmul.bf16.gmra.mxu1 %v1140_v63 }
  0xae   :  { %v1387_v8 = vpop.f32.mrf.mxu0 }
  0xaf   :  { %v340_v9 = vmul.f32 %v1387_v8, %v1387_v8  ;;  %v1391_v10 = vpop.f32.mrf.mxu1 }
  0xb0   :  { %v341_v11 = vmul.f32 %v1391_v10, %v1391_v10 }
  0xb1   :  { %v372_v12 = vmul.f32 %v340_v9, %v1387_v8 }
  0xb2   :  { %v373_v13 = vmul.f32 %v341_v11, %v1391_v10 }
  0xb3   :  { %v404_v14 = vmul.f32 0.044715, %v372_v12 }
  0xb4   :  { %v405_v15 = vmul.f32 0.044715, %v373_v13 }
  0xb5   :  { %v436_v16 = vadd.f32 %v404_v14, %v1387_v8 }
  0xb6   :  { %v437_v17 = vadd.f32 %v405_v15, %v1391_v10  ;;  %v253_v18 = vpop.f32.mrf.mxu0 }
  0xb7   :  { %v468_v19 = vmul.f32 0.7978846, %v436_v16  ;;  %v342_v20 = vmul.f32 %v253_v18, %v253_v18  ;;  %v302_v21 = vpop.f32.mrf.mxu1 }
  0xb8   :  { %v469_v22 = vmul.f32 0.7978846, %v437_v17  ;;  %v343_v23 = vmul.f32 %v302_v21, %v302_v21 }
  0xb9   :  { %v374_v24 = vmul.f32 %v342_v20, %v253_v18  ;;  %1181 = vtanh.f32 %v468_v19 }
  0xba   :  { %v375_v25 = vmul.f32 %v343_v23, %v302_v21  ;;  %1183 = vtanh.f32 %v469_v22 }
  0xbb   :  { %v406_v26 = vmul.f32 0.044715, %v374_v24 }
  0xbc   :  { %v407_v27 = vmul.f32 0.044715, %v375_v25 }
  0xbd   :  { %v438_v28 = vadd.f32 %v406_v26, %v253_v18 }
  0xbe   :  { %v439_v29 = vadd.f32 %v407_v27, %v302_v21  ;;  %v1399_v30 = vpop.f32.mrf.mxu0 }
  0xbf   :  { %v470_v31 = vmul.f32 0.7978846, %v438_v28  ;;  %v344_v32 = vmul.f32 %v1399_v30, %v1399_v30  ;;  %v1403_v33 = vpop.f32.mrf.mxu1  ;;  %v1182_v36 = vpop.eup %1181 }
  0xc0   :  { %v471_v34 = vmul.f32 0.7978846, %v439_v29  ;;  %v345_v35 = vmul.f32 %v1403_v33, %v1403_v33  ;;  %v1184_v38 = vpop.eup %1183  ;;  %v532_v42 = vadd.f32 1.0, %v1182_v36 }
  0xc1   :  { %1185 = vtanh.f32 %v470_v31  ;;  %v376_v37 = vmul.f32 %v344_v32, %v1399_v30  ;;  %v533_v44 = vadd.f32 1.0, %v1184_v38 }
  0xc2   :  { %1187 = vtanh.f32 %v471_v34  ;;  %v377_v39 = vmul.f32 %v345_v35, %v1403_v33  ;;  %v564_v55 = vmul.f32 0.5, %v532_v42 }
  0xc3   :  { %v408_v40 = vmul.f32 0.044715, %v376_v37  ;;  %v565_v58 = vmul.f32 0.5, %v533_v44 }
  0xc4   :  { %v409_v41 = vmul.f32 0.044715, %v377_v39  ;;  %v596_v0 = vmul.f32 %v564_v55, %v1387_v8 }
  0xc5   :  { %v440_v43 = vadd.f32 %v408_v40, %v1399_v30  ;;  %v597_v3 = vmul.f32 %v565_v58, %v1391_v10 }
  0xc6   :  { %v441_v45 = vadd.f32 %v409_v41, %v1403_v33  ;;  %v1411_v46 = vpop.f32.mrf.mxu0 }
  0xc7   :  { %v1186_v47 = vpop.eup %1185  ;;  %v472_v48 = vmul.f32 0.7978846, %v440_v43  ;;  %v346_v49 = vmul.f32 %v1411_v46, %v1411_v46  ;;  %v1415_v50 = vpop.f32.mrf.mxu1 }
  0xc8   :  { %v1188_v51 = vpop.eup %1187  ;;  %v473_v52 = vmul.f32 0.7978846, %v441_v45  ;;  %v347_v53 = vmul.f32 %v1415_v50, %v1415_v50  ;;  %v534_v54 = vadd.f32 1.0, %v1186_v47 }
  0xc9   :  { %v378_v56 = vmul.f32 %v346_v49, %v1411_v46  ;;  %v535_v57 = vadd.f32 1.0, %v1188_v51  ;;  %1189 = vtanh.f32 %v472_v48 }
  0xca   :  { %v379_v59 = vmul.f32 %v347_v53, %v1415_v50  ;;  %v566_v60 = vmul.f32 0.5, %v534_v54  ;;  %1191 = vtanh.f32 %v473_v52 }
  0xcb   :  { %v410_v61 = vmul.f32 0.044715, %v378_v56  ;;  %v567_v62 = vmul.f32 0.5, %v535_v57 }
  0xcc   :  { %v411_v63 = vmul.f32 0.044715, %v379_v59  ;;  %v598_v1 = vmul.f32 %v566_v60, %v253_v18 }
  0xcd   :  { %v442_v2 = vadd.f32 %v410_v61, %v1411_v46  ;;  %v599_v4 = vmul.f32 %v567_v62, %v302_v21 }
  0xce   :  { %v443_v5 = vadd.f32 %v411_v63, %v1415_v50  ;;  %v1425_v6 = vpop.f32.mrf.mxu0  ;;  %v644_v7 = vpack.c.bf16 %v598_v1, %v596_v0 }
  0xcf   :  { %v474_v9 = vmul.f32 0.7978846, %v442_v2  ;;  %v348_v11 = vmul.f32 %v1425_v6, %v1425_v6  ;;  %v1429_v12 = vpop.f32.mrf.mxu1  ;;  %v645_v13 = vpack.c.bf16 %v599_v4, %v597_v3  ;;  %v1190_v15 = vpop.eup %1189 }
  0xd0   :  { %v475_v14 = vmul.f32 0.7978846, %v443_v5  ;;  %v349_v8 = vmul.f32 %v1429_v12, %v1429_v12  ;;  %796 = vmatmul.bf16.vlgmr.msra.gmra.mxu2 %v644_v7  ;;  %v1192_v16 = vpop.eup %1191  ;;  %v536_v20 = vadd.f32 1.0, %v1190_v15 }
  0xd1   :  { %1193 = vtanh.f32 %v474_v9  ;;  %v380_v10 = vmul.f32 %v348_v11, %v1425_v6  ;;  %845 = vmatmul.bf16.vlgmr.msra.gmra.mxu3 %v645_v13  ;;  %v537_v22 = vadd.f32 1.0, %v1192_v16 }
  0xd2   :  { %1195 = vtanh.f32 %v475_v14  ;;  %v381_v17 = vmul.f32 %v349_v8, %v1429_v12  ;;  %v568_v35 = vmul.f32 0.5, %v536_v20 }
  0xd3   :  { %v412_v18 = vmul.f32 0.044715, %v380_v10  ;;  %v569_v38 = vmul.f32 0.5, %v537_v22 }
  0xd4   :  { %v413_v19 = vmul.f32 0.044715, %v381_v17  ;;  %v600_v44 = vmul.f32 %v568_v35, %v1399_v30 }
  0xd5   :  { %v444_v21 = vadd.f32 %v412_v18, %v1425_v6  ;;  %v601_v48 = vmul.f32 %v569_v38, %v1403_v33 }
  0xd6   :  { %v445_v23 = vadd.f32 %v413_v19, %v1429_v12  ;;  %v1437_v24 = vpop.f32.mrf.mxu0 }
  0xd7   :  { %v1194_v25 = vpop.eup %1193  ;;  %v476_v26 = vmul.f32 0.7978846, %v444_v21  ;;  %v350_v27 = vmul.f32 %v1437_v24, %v1437_v24  ;;  %v1441_v28 = vpop.f32.mrf.mxu1 }
  0xd8   :  { %v1196_v29 = vpop.eup %1195  ;;  %v477_v31 = vmul.f32 0.7978846, %v445_v23  ;;  %v351_v32 = vmul.f32 %v1441_v28, %v1441_v28  ;;  %v538_v34 = vadd.f32 1.0, %v1194_v25 }
  0xd9   :  { %v382_v36 = vmul.f32 %v350_v27, %v1437_v24  ;;  %v539_v37 = vadd.f32 1.0, %v1196_v29  ;;  %1197 = vtanh.f32 %v476_v26 }
  0xda   :  { %v383_v39 = vmul.f32 %v351_v32, %v1441_v28  ;;  %v570_v40 = vmul.f32 0.5, %v538_v34  ;;  %1199 = vtanh.f32 %v477_v31 }
  0xdb   :  { %v414_v41 = vmul.f32 0.044715, %v382_v36  ;;  %v571_v42 = vmul.f32 0.5, %v539_v37 }
  0xdc   :  { %v415_v43 = vmul.f32 0.044715, %v383_v39  ;;  %v602_v45 = vmul.f32 %v570_v40, %v1411_v46 }
  0xdd   :  { %v446_v47 = vadd.f32 %v414_v41, %v1437_v24  ;;  %v603_v49 = vmul.f32 %v571_v42, %v1415_v50 }
  0xde   :  { %v447_v51 = vadd.f32 %v415_v43, %v1441_v28  ;;  %v1453_v52 = vpop.f32.mrf.mxu0  ;;  %v646_v53 = vpack.c.bf16 %v602_v45, %v600_v44 }
  0xdf   :  { %v478_v54 = vmul.f32 0.7978846, %v446_v47  ;;  %v352_v55 = vmul.f32 %v1453_v52, %v1453_v52  ;;  %v1457_v56 = vpop.f32.mrf.mxu1  ;;  %v647_v30 = vpack.c.bf16 %v603_v49, %v601_v48  ;;  %v1198_v33 = vpop.eup %1197 }
  0xe0   :  { %v479_v57 = vmul.f32 0.7978846, %v447_v51  ;;  %v353_v46 = vmul.f32 %v1457_v56, %v1457_v56  ;;  %801 = vmatmul.bf16.gmra.mxu2 %v646_v53  ;;  %v1200_v58 = vpop.eup %1199  ;;  %v540_v62 = vadd.f32 1.0, %v1198_v33 }
  0xe1   :  { %1201 = vtanh.f32 %v478_v54  ;;  %v384_v50 = vmul.f32 %v352_v55, %v1453_v52  ;;  %850 = vmatmul.bf16.gmra.mxu3 %v647_v30  ;;  %v541_v0 = vadd.f32 1.0, %v1200_v58 }
  0xe2   :  { %1203 = vtanh.f32 %v479_v57  ;;  %v385_v59 = vmul.f32 %v353_v46, %v1457_v56  ;;  %v572_v8 = vmul.f32 0.5, %v540_v62 }
  0xe3   :  { %v416_v60 = vmul.f32 0.044715, %v384_v50  ;;  %v573_v16 = vmul.f32 0.5, %v541_v0 }
  0xe4   :  { %v417_v61 = vmul.f32 0.044715, %v385_v59  ;;  %v604_v22 = vmul.f32 %v572_v8, %v1425_v6 }
  0xe5   :  { %v448_v63 = vadd.f32 %v416_v60, %v1453_v52  ;;  %v605_v26 = vmul.f32 %v573_v16, %v1429_v12 }
  0xe6   :  { %v449_v1 = vadd.f32 %v417_v61, %v1457_v56  ;;  %v1465_v2 = vpop.f32.mrf.mxu0 }
  0xe7   :  { %v1202_v3 = vpop.eup %1201  ;;  %v480_v4 = vmul.f32 0.7978846, %v448_v63  ;;  %v354_v5 = vmul.f32 %v1465_v2, %v1465_v2  ;;  %v1469_v7 = vpop.f32.mrf.mxu1 }
  0xe8   :  { %v1204_v9 = vpop.eup %1203  ;;  %v481_v11 = vmul.f32 0.7978846, %v449_v1  ;;  %v355_v13 = vmul.f32 %v1469_v7, %v1469_v7  ;;  %v542_v14 = vadd.f32 1.0, %v1202_v3 }
  0xe9   :  { %v386_v15 = vmul.f32 %v354_v5, %v1465_v2  ;;  %v543_v10 = vadd.f32 1.0, %v1204_v9  ;;  %1205 = vtanh.f32 %v480_v4 }
  0xea   :  { %v387_v17 = vmul.f32 %v355_v13, %v1469_v7  ;;  %v574_v18 = vmul.f32 0.5, %v542_v14  ;;  %1207 = vtanh.f32 %v481_v11 }
  0xeb   :  { %v418_v19 = vmul.f32 0.044715, %v386_v15  ;;  %v575_v20 = vmul.f32 0.5, %v543_v10 }
  0xec   :  { %v419_v21 = vmul.f32 0.044715, %v387_v17  ;;  %v606_v23 = vmul.f32 %v574_v18, %v1437_v24 }
  0xed   :  { %v450_v25 = vadd.f32 %v418_v19, %v1465_v2  ;;  %v607_v27 = vmul.f32 %v575_v20, %v1441_v28 }
  0xee   :  { %v451_v29 = vadd.f32 %v419_v21, %v1469_v7  ;;  %v1481_v31 = vpop.f32.mrf.mxu0  ;;  %v648_v32 = vpack.c.bf16 %v606_v23, %v604_v22 }
  0xef   :  { %v482_v34 = vmul.f32 0.7978846, %v450_v25  ;;  %v356_v35 = vmul.f32 %v1481_v31, %v1481_v31  ;;  %v1485_v36 = vpop.f32.mrf.mxu1  ;;  %v649_v6 = vpack.c.bf16 %v607_v27, %v605_v26  ;;  %v1206_v12 = vpop.eup %1205 }
  0xf0   :  { %v483_v37 = vmul.f32 0.7978846, %v451_v29  ;;  %v357_v24 = vmul.f32 %v1485_v36, %v1485_v36  ;;  %806 = vmatmul.bf16.gmra.mxu2 %v648_v32  ;;  %v1208_v38 = vpop.eup %1207  ;;  %v544_v42 = vadd.f32 1.0, %v1206_v12 }
  0xf1   :  { %1209 = vtanh.f32 %v482_v34  ;;  %v388_v28 = vmul.f32 %v356_v35, %v1481_v31  ;;  %855 = vmatmul.bf16.gmra.mxu3 %v649_v6  ;;  %v545_v44 = vadd.f32 1.0, %v1208_v38 }
  0xf2   :  { %1211 = vtanh.f32 %v483_v37  ;;  %v389_v39 = vmul.f32 %v357_v24, %v1485_v36  ;;  %v576_v46 = vmul.f32 0.5, %v544_v42 }
  0xf3   :  { %v420_v40 = vmul.f32 0.044715, %v388_v28  ;;  %v577_v58 = vmul.f32 0.5, %v545_v44 }
  0xf4   :  { %v421_v41 = vmul.f32 0.044715, %v389_v39  ;;  %v608_v0 = vmul.f32 %v576_v46, %v1453_v52 }
  0xf5   :  { %v452_v43 = vadd.f32 %v420_v40, %v1481_v31  ;;  %v609_v4 = vmul.f32 %v577_v58, %v1457_v56 }
  0xf6   :  { %v453_v45 = vadd.f32 %v421_v41, %v1485_v36  ;;  %v1493_v47 = vpop.f32.mrf.mxu0 }
  0xf7   :  { %v1210_v48 = vpop.eup %1209  ;;  %v484_v49 = vmul.f32 0.7978846, %v452_v43  ;;  %v358_v51 = vmul.f32 %v1493_v47, %v1493_v47  ;;  %v1497_v53 = vpop.f32.mrf.mxu1 }
  0xf8   :  { %v1212_v54 = vpop.eup %1211  ;;  %v485_v55 = vmul.f32 0.7978846, %v453_v45  ;;  %v359_v30 = vmul.f32 %v1497_v53, %v1497_v53  ;;  %v546_v57 = vadd.f32 1.0, %v1210_v48 }
  0xf9   :  { %v390_v33 = vmul.f32 %v358_v51, %v1493_v47  ;;  %v547_v50 = vadd.f32 1.0, %v1212_v54  ;;  %1213 = vtanh.f32 %v484_v49 }
  0xfa   :  { %v391_v59 = vmul.f32 %v359_v30, %v1497_v53  ;;  %v578_v60 = vmul.f32 0.5, %v546_v57  ;;  %1215 = vtanh.f32 %v485_v55 }
  0xfb   :  { %v422_v61 = vmul.f32 0.044715, %v390_v33  ;;  %v579_v62 = vmul.f32 0.5, %v547_v50 }
  0xfc   :  { %v423_v63 = vmul.f32 0.044715, %v391_v59  ;;  %v610_v1 = vmul.f32 %v578_v60, %v1465_v2 }
  0xfd   :  { %v454_v3 = vadd.f32 %v422_v61, %v1493_v47  ;;  %v611_v5 = vmul.f32 %v579_v62, %v1469_v7 }
  0xfe   :  { %v455_v9 = vadd.f32 %v423_v63, %v1497_v53  ;;  %v1509_v11 = vpop.f32.mrf.mxu0  ;;  %v650_v13 = vpack.c.bf16 %v610_v1, %v608_v0 }
  0xff   :  { %v486_v14 = vmul.f32 0.7978846, %v454_v3  ;;  %v360_v8 = vmul.f32 %v1509_v11, %v1509_v11  ;;  %v1513_v15 = vpop.f32.mrf.mxu1  ;;  %v651_v52 = vpack.c.bf16 %v611_v5, %v609_v4  ;;  %v1214_v56 = vpop.eup %1213 }
 0x100   :  { %v487_v10 = vmul.f32 0.7978846, %v455_v9  ;;  %v361_v2 = vmul.f32 %v1513_v15, %v1513_v15  ;;  %811 = vmatmul.bf16.gmra.mxu2 %v650_v13  ;;  %v1216_v16 = vpop.eup %1215  ;;  %v548_v20 = vadd.f32 1.0, %v1214_v56 }
 0x101   :  { %1217 = vtanh.f32 %v486_v14  ;;  %v392_v7 = vmul.f32 %v360_v8, %v1509_v11  ;;  %860 = vmatmul.bf16.gmra.mxu3 %v651_v52  ;;  %v549_v22 = vadd.f32 1.0, %v1216_v16 }
 0x102   :  { %1219 = vtanh.f32 %v487_v10  ;;  %v393_v17 = vmul.f32 %v361_v2, %v1513_v15  ;;  %v580_v24 = vmul.f32 0.5, %v548_v20 }
 0x103   :  { %v424_v18 = vmul.f32 0.044715, %v392_v7  ;;  %v581_v38 = vmul.f32 0.5, %v549_v22 }
 0x104   :  { %v425_v19 = vmul.f32 0.044715, %v393_v17  ;;  %v612_v44 = vmul.f32 %v580_v24, %v1481_v31 }
 0x105   :  { %v456_v21 = vadd.f32 %v424_v18, %v1509_v11  ;;  %v613_v49 = vmul.f32 %v581_v38, %v1485_v36 }
 0x106   :  { %v457_v23 = vadd.f32 %v425_v19, %v1513_v15  ;;  %v1521_v25 = vpop.f32.mrf.mxu0 }
 0x107   :  { %v1218_v26 = vpop.eup %1217  ;;  %v488_v27 = vmul.f32 0.7978846, %v456_v21  ;;  %v362_v29 = vmul.f32 %v1521_v25, %v1521_v25  ;;  %v1525_v32 = vpop.f32.mrf.mxu1 }
 0x108   :  { %v1220_v34 = vpop.eup %1219  ;;  %v489_v35 = vmul.f32 0.7978846, %v457_v23  ;;  %v363_v6 = vmul.f32 %v1525_v32, %v1525_v32  ;;  %v550_v37 = vadd.f32 1.0, %v1218_v26 }
 0x109   :  { %v394_v12 = vmul.f32 %v362_v29, %v1521_v25  ;;  %v551_v28 = vadd.f32 1.0, %v1220_v34  ;;  %1221 = vtanh.f32 %v488_v27 }
 0x10a   :  { %v395_v39 = vmul.f32 %v363_v6, %v1525_v32  ;;  %v582_v40 = vmul.f32 0.5, %v550_v37  ;;  %1223 = vtanh.f32 %v489_v35 }
 0x10b   :  { %v426_v41 = vmul.f32 0.044715, %v394_v12  ;;  %v583_v42 = vmul.f32 0.5, %v551_v28 }
 0x10c   :  { %v427_v43 = vmul.f32 0.044715, %v395_v39  ;;  %v614_v45 = vmul.f32 %v582_v40, %v1493_v47 }
 0x10d   :  { %v458_v48 = vadd.f32 %v426_v41, %v1521_v25  ;;  %v615_v51 = vmul.f32 %v583_v42, %v1497_v53 }
 0x10e   :  { %v459_v54 = vadd.f32 %v427_v43, %v1525_v32  ;;  %v1537_v55 = vpop.f32.mrf.mxu0  ;;  %v652_v30 = vpack.c.bf16 %v614_v45, %v612_v44 }
 0x10f   :  { %v490_v57 = vmul.f32 0.7978846, %v458_v48  ;;  %v364_v46 = vmul.f32 %v1537_v55, %v1537_v55  ;;  %v1541_v33 = vpop.f32.mrf.mxu1  ;;  %v653_v31 = vpack.c.bf16 %v615_v51, %v613_v49  ;;  %v1222_v36 = vpop.eup %1221 }
 0x110   :  { %v491_v50 = vmul.f32 0.7978846, %v459_v54  ;;  %v365_v47 = vmul.f32 %v1541_v33, %v1541_v33  ;;  %816 = vmatmul.bf16.gmra.mxu2 %v652_v30  ;;  %v1224_v58 = vpop.eup %1223  ;;  %v552_v62 = vadd.f32 1.0, %v1222_v36 }
 0x111   :  { %1225 = vtanh.f32 %v490_v57  ;;  %v396_v53 = vmul.f32 %v364_v46, %v1537_v55  ;;  %865 = vmatmul.bf16.gmra.mxu3 %v653_v31  ;;  %v553_v0 = vadd.f32 1.0, %v1224_v58 }
 0x112   :  { %1227 = vtanh.f32 %v491_v50  ;;  %v397_v59 = vmul.f32 %v365_v47, %v1541_v33  ;;  %v584_v2 = vmul.f32 0.5, %v552_v62 }
 0x113   :  { %v428_v60 = vmul.f32 0.044715, %v396_v53  ;;  %v585_v16 = vmul.f32 0.5, %v553_v0 }
 0x114   :  { %v429_v61 = vmul.f32 0.044715, %v397_v59  ;;  %v616_v22 = vmul.f32 %v584_v2, %v1509_v11 }
 0x115   :  { %v460_v63 = vadd.f32 %v428_v60, %v1537_v55  ;;  %v617_v27 = vmul.f32 %v585_v16, %v1513_v15 }
 0x116   :  { %v461_v1 = vadd.f32 %v429_v61, %v1541_v33  ;;  %v1549_v3 = vpop.f32.mrf.mxu0 }
 0x117   :  { %v1226_v4 = vpop.eup %1225  ;;  %v492_v5 = vmul.f32 0.7978846, %v460_v63  ;;  %v366_v9 = vmul.f32 %v1549_v3, %v1549_v3  ;;  %v1553_v13 = vpop.f32.mrf.mxu1 }
 0x118   :  { %v1228_v14 = vpop.eup %1227  ;;  %v493_v8 = vmul.f32 0.7978846, %v461_v1  ;;  %v367_v52 = vmul.f32 %v1553_v13, %v1553_v13  ;;  %v554_v10 = vadd.f32 1.0, %v1226_v4 }
 0x119   :  { %v398_v56 = vmul.f32 %v366_v9, %v1549_v3  ;;  %v555_v7 = vadd.f32 1.0, %v1228_v14  ;;  %1229 = vtanh.f32 %v492_v5 }
 0x11a   :  { %v399_v17 = vmul.f32 %v367_v52, %v1553_v13  ;;  %v586_v18 = vmul.f32 0.5, %v554_v10  ;;  %1231 = vtanh.f32 %v493_v8 }
 0x11b   :  { %v430_v19 = vmul.f32 0.044715, %v398_v56  ;;  %v587_v20 = vmul.f32 0.5, %v555_v7 }
 0x11c   :  { %v431_v21 = vmul.f32 0.044715, %v399_v17  ;;  %v618_v23 = vmul.f32 %v586_v18, %v1521_v25 }
 0x11d   :  { %v462_v26 = vadd.f32 %v430_v19, %v1549_v3  ;;  %v619_v29 = vmul.f32 %v587_v20, %v1525_v32 }
 0x11e   :  { %v463_v34 = vadd.f32 %v431_v21, %v1553_v13  ;;  %v1565_v35 = vpop.f32.mrf.mxu0  ;;  %v654_v6 = vpack.c.bf16 %v618_v23, %v616_v22 }
 0x11f   :  { %v494_v37 = vmul.f32 0.7978846, %v462_v26  ;;  %v368_v24 = vmul.f32 %v1565_v35, %v1565_v35  ;;  %v1569_v12 = vpop.f32.mrf.mxu1  ;;  %v655_v11 = vpack.c.bf16 %v619_v29, %v617_v27  ;;  %v1230_v15 = vpop.eup %1229 }
 0x120   :  { %v495_v28 = vmul.f32 0.7978846, %v463_v34  ;;  %v369_v25 = vmul.f32 %v1569_v12, %v1569_v12  ;;  %821 = vmatmul.bf16.gmra.mxu2 %v654_v6  ;;  %v1232_v38 = vpop.eup %1231  ;;  %v556_v42 = vadd.f32 1.0, %v1230_v15 }
 0x121   :  { %1233 = vtanh.f32 %v494_v37  ;;  %v400_v32 = vmul.f32 %v368_v24, %v1565_v35  ;;  %870 = vmatmul.bf16.gmra.mxu3 %v655_v11  ;;  %v557_v44 = vadd.f32 1.0, %v1232_v38 }
 0x122   :  { %1235 = vtanh.f32 %v495_v28  ;;  %v401_v39 = vmul.f32 %v369_v25, %v1569_v12  ;;  %v588_v47 = vmul.f32 0.5, %v556_v42 }
 0x123   :  { %v432_v40 = vmul.f32 0.044715, %v400_v32  ;;  %v589_v58 = vmul.f32 0.5, %v557_v44 }
 0x124   :  { %v433_v41 = vmul.f32 0.044715, %v401_v39  ;;  %v620_v0 = vmul.f32 %v588_v47, %v1537_v55 }
 0x125   :  { %v464_v43 = vadd.f32 %v432_v40, %v1565_v35  ;;  %v621_v5 = vmul.f32 %v589_v58, %v1541_v33 }
 0x126   :  { %v465_v45 = vadd.f32 %v433_v41, %v1569_v12  ;;  %v288_v48 = vpop.f32.mrf.mxu0 }
 0x127   :  { %v1234_v49 = vpop.eup %1233  ;;  %v496_v51 = vmul.f32 0.7978846, %v464_v43  ;;  %v370_v54 = vmul.f32 %v288_v48, %v288_v48  ;;  %v337_v30 = vpop.f32.mrf.mxu1 }
 0x128   :  { %v1236_v57 = vpop.eup %1235  ;;  %v497_v46 = vmul.f32 0.7978846, %v465_v45  ;;  %v371_v31 = vmul.f32 %v337_v30, %v337_v30  ;;  %v558_v50 = vadd.f32 1.0, %v1234_v49 }
 0x129   :  { %v402_v36 = vmul.f32 %v370_v54, %v288_v48  ;;  %v559_v53 = vadd.f32 1.0, %v1236_v57  ;;  %1237 = vtanh.f32 %v496_v51 }
 0x12a   :  { %v403_v59 = vmul.f32 %v371_v31, %v337_v30  ;;  %v590_v60 = vmul.f32 0.5, %v558_v50  ;;  %1239 = vtanh.f32 %v497_v46 }
 0x12b   :  { %v434_v61 = vmul.f32 0.044715, %v402_v36  ;;  %v591_v62 = vmul.f32 0.5, %v559_v53 }
 0x12c   :  { %v435_v63 = vmul.f32 0.044715, %v403_v59  ;;  %v622_v1 = vmul.f32 %v590_v60, %v1549_v3 }
 0x12d   :  { %v466_v4 = vadd.f32 %v434_v61, %v288_v48  ;;  %v623_v9 = vmul.f32 %v591_v62, %v1553_v13 }
 0x12e   :  { %v467_v14 = vadd.f32 %v435_v63, %v337_v30  ;;  %v656_v8 = vpack.c.bf16 %v622_v1, %v620_v0 }
 0x12f   :  { %v498_v52 = vmul.f32 0.7978846, %v466_v4  ;;  %v657_v10 = vpack.c.bf16 %v623_v9, %v621_v5  ;;  %v1238_v56 = vpop.eup %1237 }
 0x130   :  { %v499_v2 = vmul.f32 0.7978846, %v467_v14  ;;  %826 = vmatmul.bf16.gmra.mxu2 %v656_v8  ;;  %v1240_v7 = vpop.eup %1239  ;;  %v560_v16 = vadd.f32 1.0, %v1238_v56 }
 0x131   :  { %1241 = vtanh.f32 %v498_v52  ;;  %875 = vmatmul.bf16.gmra.mxu3 %v657_v10  ;;  %v561_v55 = vadd.f32 1.0, %v1240_v7 }
 0x132   :  { %1243 = vtanh.f32 %v499_v2  ;;  %v592_v19 = vmul.f32 0.5, %v560_v16 }
 0x133   :  { %v593_v20 = vmul.f32 0.5, %v561_v55 }
 0x134   :  { %v624_v22 = vmul.f32 %v592_v19, %v1565_v35 }
 0x135   :  { %v625_v26 = vmul.f32 %v593_v20, %v1569_v12 }
 0x137   :  { %v1242_v17 = vpop.eup %1241 }
 0x138   :  { %v1244_v3 = vpop.eup %1243  ;;  %v562_v18 = vadd.f32 1.0, %v1242_v17 }
 0x139   :  { %v563_v33 = vadd.f32 1.0, %v1244_v3 }
 0x13a   :  { %v594_v13 = vmul.f32 0.5, %v562_v18 }
 0x13b   :  { %v595_v21 = vmul.f32 0.5, %v563_v33 }
 0x13c   :  { %v626_v23 = vmul.f32 %v594_v13, %v288_v48 }
 0x13d   :  { %v627_v27 = vmul.f32 %v595_v21, %v337_v30 }
 0x13e   :  { %v658_v29 = vpack.c.bf16 %v626_v23, %v624_v22 }
 0x13f   :  { %v659_v34 = vpack.c.bf16 %v627_v27, %v625_v26 }
 0x140   :  { %831 = vmatmul.bf16.gmra.mxu2 %v658_v29 }
 0x141   :  { %880 = vmatmul.bf16.gmra.mxu3 %v659_v34 }
 0x153   :  { %v797_v6 = vpop.f32.mrf.mxu2 }
 0x154   :  { %v846_v37 = vpop.f32.mrf.mxu3 }
 0x155   :  { %v847_v24 = vadd.f32 %v846_v37, %v797_v6 }
 0x157   :  { %937 = vst [vmem:[#allocation9] sm:$0xff] %v847_v24 }
 0x15b   :  { %v799_v11 = vpop.f32.mrf.mxu2 }
 0x15c   :  { %v848_v28 = vpop.f32.mrf.mxu3 }
 0x15d   :  { %v849_v25 = vadd.f32 %v848_v28, %v799_v11 }
 0x15f   :  { %938 = vst [vmem:[#allocation9 + $0x8] sm:$0xff] %v849_v25 }
 0x163   :  { %v802_v15 = vpop.f32.mrf.mxu2 }
 0x164   :  { %v851_v32 = vpop.f32.mrf.mxu3 }
 0x165   :  { %v852_v38 = vadd.f32 %v851_v32, %v802_v15 }
 0x167   :  { %939 = vst [vmem:[#allocation9 + $0x10] sm:$0xff] %v852_v38 }
 0x16b   :  { %v804_v35 = vpop.f32.mrf.mxu2 }
 0x16c   :  { %v853_v39 = vpop.f32.mrf.mxu3 }
 0x16d   :  { %v854_v12 = vadd.f32 %v853_v39, %v804_v35 }
 0x16f   :  { %940 = vst [vmem:[#allocation9 + $0x18] sm:$0xff] %v854_v12 }
 0x173   :  { %v807_v40 = vpop.f32.mrf.mxu2 }
 0x174   :  { %v856_v41 = vpop.f32.mrf.mxu3 }
 0x175   :  { %v857_v42 = vadd.f32 %v856_v41, %v807_v40 }
 0x177   :  { %941 = vst [vmem:[#allocation9 + $0x20] sm:$0xff] %v857_v42 }
 0x17b   :  { %v809_v43 = vpop.f32.mrf.mxu2 }
 0x17c   :  { %v858_v44 = vpop.f32.mrf.mxu3 }
 0x17d   :  { %v859_v45 = vadd.f32 %v858_v44, %v809_v43 }
 0x17f   :  { %942 = vst [vmem:[#allocation9 + $0x28] sm:$0xff] %v859_v45 }
 0x183   :  { %v812_v48 = vpop.f32.mrf.mxu2 }
 0x184   :  { %v861_v49 = vpop.f32.mrf.mxu3 }
 0x185   :  { %v862_v51 = vadd.f32 %v861_v49, %v812_v48 }
 0x187   :  { %943 = vst [vmem:[#allocation9 + $0x30] sm:$0xff] %v862_v51 }
 0x18b   :  { %v814_v54 = vpop.f32.mrf.mxu2 }
 0x18c   :  { %v863_v30 = vpop.f32.mrf.mxu3 }
 0x18d   :  { %v864_v57 = vadd.f32 %v863_v30, %v814_v54 }
 0x18f   :  { %944 = vst [vmem:[#allocation9 + $0x38] sm:$0xff] %v864_v57 }
 0x193   :  { %v817_v46 = vpop.f32.mrf.mxu2 }
 0x194   :  { %v866_v31 = vpop.f32.mrf.mxu3 }
 0x195   :  { %v867_v50 = vadd.f32 %v866_v31, %v817_v46 }
 0x197   :  { %945 = vst [vmem:[#allocation9 + $0x40] sm:$0xff] %v867_v50 }
 0x19b   :  { %v819_v47 = vpop.f32.mrf.mxu2 }
 0x19c   :  { %v868_v36 = vpop.f32.mrf.mxu3 }
 0x19d   :  { %v869_v53 = vadd.f32 %v868_v36, %v819_v47 }
 0x19f   :  { %946 = vst [vmem:[#allocation9 + $0x48] sm:$0xff] %v869_v53 }
 0x1a3   :  { %v822_v58 = vpop.f32.mrf.mxu2 }
 0x1a4   :  { %v871_v59 = vpop.f32.mrf.mxu3 }
 0x1a5   :  { %v872_v60 = vadd.f32 %v871_v59, %v822_v58 }
 0x1a7   :  { %947 = vst [vmem:[#allocation9 + $0x50] sm:$0xff] %v872_v60 }
 0x1ab   :  { %v824_v61 = vpop.f32.mrf.mxu2 }
 0x1ac   :  { %v873_v62 = vpop.f32.mrf.mxu3 }
 0x1ad   :  { %v874_v63 = vadd.f32 %v873_v62, %v824_v61 }
 0x1af   :  { %948 = vst [vmem:[#allocation9 + $0x58] sm:$0xff] %v874_v63 }
 0x1b3   :  { %v827_v0 = vpop.f32.mrf.mxu2 }
 0x1b4   :  { %v876_v1 = vpop.f32.mrf.mxu3 }
 0x1b5   :  { %v877_v4 = vadd.f32 %v876_v1, %v827_v0 }
 0x1b7   :  { %949 = vst [vmem:[#allocation9 + $0x60] sm:$0xff] %v877_v4 }
 0x1bb   :  { %v829_v5 = vpop.f32.mrf.mxu2 }
 0x1bc   :  { %v878_v9 = vpop.f32.mrf.mxu3 }
 0x1bd   :  { %v879_v14 = vadd.f32 %v878_v9, %v829_v5 }
 0x1bf   :  { %950 = vst [vmem:[#allocation9 + $0x68] sm:$0xff] %v879_v14 }
 0x1c3   :  { %v832_v8 = vpop.f32.mrf.mxu2 }
 0x1c4   :  { %v881_v52 = vpop.f32.mrf.mxu3 }
 0x1c5   :  { %v882_v10 = vadd.f32 %v881_v52, %v832_v8 }
 0x1c7   :  { %951 = vst [vmem:[#allocation9 + $0x70] sm:$0xff] %v882_v10 }
 0x1cb   :  { %v834_v2 = vpop.f32.mrf.mxu2 }
 0x1cc   :  { %v883_v56 = vpop.f32.mrf.mxu3 }
 0x1cd   :  { %v884_v7 = vadd.f32 %v883_v56, %v834_v2 }
 0x1cf   :  { %952 = vst [vmem:[#allocation9 + $0x78] sm:$0xff] %v884_v7 }
 0x1d0   :  { %965 = dma.vmem_to_hbm [thread:$0]  %s958_s29, 2048, %s960_s5, [#allocation5], %s1348_s20, %s1348_s20, %s1349_s21  }
 0x1d1   :  { %1345 = dma.done.wait [#allocation5], 2048  }
 0x1d2   :  { %1346 = vsyncadd [#allocation5], 4294965248 }
 0x1d3   :  { %970 = vsyncpa [#allocation4], 1 }
 0x1d4   :  { %971 = vsyncpa [#allocation7], 1 }
 0x1d5   :  { %972 = vsyncpa [#allocation5], 1 }

</bundles_post_ra>
